<compile_context>
chip_gen: v5e
topology: v5e:2x2
jax: 0.10.0
libtpu: 0.0.40
codegen_flags: <defaults>
</compile_context>

<pallas_src>
import jax
import jax.numpy as jnp
from jax.experimental import pallas as pl
from jax.experimental.pallas import tpu as pltpu

_LANES = 128


def _cdiv(a, b):
    return -(-a // b)


def _round_up(a, b):
    return _cdiv(a, b) * b


def _make_ssd_kernel(rows, row_tile, steps, needs_mask):
    """Builds a kernel accumulating sum-of-squared-differences directly into
    the resident (8, 128) output block of the current parallel partition."""

    def kernel(x_ref, t_ref, out_ref):
        p = pl.program_id(0)
        s = pl.program_id(1)

        @pl.when(s == 0)
        def _():
            out_ref[...] = jnp.zeros_like(out_ref)

        d = x_ref[...].astype(jnp.float32) - t_ref[...].astype(jnp.float32)
        if needs_mask:
            # Boundary block may extend past the true row count; the
            # out-of-bounds part of the input tile is unspecified, so zero it.
            start = (p * steps + s) * row_tile
            rid = start + jax.lax.broadcasted_iota(
                jnp.int32, (row_tile, _LANES), 0)
            d = jnp.where(rid < rows, d, 0.0)
        sq = d * d
        # VPU-only reduction across vreg groups; keep the (8,128) lane layout.
        out_ref[...] += jnp.sum(sq.reshape(-1, 8, _LANES), axis=0)

    return kernel


def content_loss_forward(x, target, *, row_tile=4096, n_partial=1,
                         use_pallas=True):
    """Returns (output, loss): output is x (pass-through),
    loss == mean((x - target)**2) computed in a Pallas TPU kernel."""
    assert x.shape == target.shape, "input/target shape mismatch"
    total = x.size
    itemsize = jnp.dtype(x.dtype).itemsize
    # dtype-aware minimum sublane count (f32: 8, bf16: 16, int8/fp8: 32).
    min_sub = max(8, 32 // max(itemsize, 1))

    def _xla_ssd(a, b):
        d = a.astype(jnp.float32) - b.astype(jnp.float32)
        return jnp.sum(d * d)

    if total == 0:
        return x, jnp.float32(0.0)

    rows = total // _LANES
    if not use_pallas or rows < min_sub:
        # Tiny-tensor fallback: plain XLA fusion beats kernel launch overhead.
        return x, _xla_ssd(x, target) / jnp.float32(total)

    xf = x.reshape(-1)           # free (pure metadata) reshape
    tf = target.reshape(-1)
    bulk = rows * _LANES
    tail = total - bulk
    tail_ssd = jnp.float32(0.0)
    if tail:
        # Rare ragged case (< 128 trailing elements): tiny plain-XLA add; the
        # 128-aligned bulk still streams through Pallas.
        tail_ssd = _xla_ssd(xf[bulk:], tf[bulk:])
        xf = xf[:bulk]
        tf = tf[:bulk]
    x2d = xf.reshape(rows, _LANES)
    t2d = tf.reshape(rows, _LANES)

    # Cap tile size so 2 inputs x 2 pipeline buffers stay well inside the
    # scoped-VMEM budget of every generation (v7x physical is 64 MiB).
    max_tile_bytes_total = 40 * 1024 * 1024
    max_rt = max(min_sub,
                 (max_tile_bytes_total // (4 * _LANES * itemsize))
                 // min_sub * min_sub)
    row_tile = max(min(int(row_tile), max_rt), min_sub)

    n_partial = max(1, int(n_partial))

    def plan(npart):
        rt = min(_round_up(row_tile, min_sub),
                 _round_up(_cdiv(rows, npart), min_sub))
        rt = max(rt, min_sub)
        st = _cdiv(rows, npart * rt)
        return rt, st

    rt, steps = plan(n_partial)
    # Every parallel partition must own at least one valid row.
    while n_partial > 1 and (n_partial - 1) * steps * rt >= rows:
        n_partial -= 1
        rt, steps = plan(n_partial)

    needs_mask = (n_partial * steps * rt) != rows

    # Explicit scoped-VMEM limit: enough for the double-buffered input tiles
    # plus headroom, never above what v7x (64 MiB physical) can take.
    vmem_need = 4 * rt * _LANES * itemsize + (2 << 20)
    vmem_limit = int(min(max(vmem_need, 16 * 1024 * 1024), 48 * 1024 * 1024))

    kernel = _make_ssd_kernel(rows, rt, steps, needs_mask)

    # TODO(synk): on v7x, switch the outer axis to pltpu.CORE_PARALLEL with
    # n_partial = num TensorCores once chip detection is plumbed through.
    partials = pl.pallas_call(
        kernel,
        out_shape=jax.ShapeDtypeStruct((n_partial * 8, _LANES), jnp.float32),
        grid_spec=pltpu.PrefetchScalarGridSpec(
            num_scalar_prefetch=0,
            grid=(n_partial, steps),
            in_specs=[
                pl.BlockSpec((rt, _LANES), lambda p, s: (p * steps + s, 0)),
                pl.BlockSpec((rt, _LANES), lambda p, s: (p * steps + s, 0)),
            ],
            out_specs=pl.BlockSpec((8, _LANES), lambda p, s: (p, 0)),
        ),
        compiler_params=pltpu.CompilerParams(
            dimension_semantics=("parallel", "arbitrary"),
            vmem_limit_bytes=vmem_limit,
        ),
        cost_estimate=pl.CostEstimate(
            flops=3 * bulk,
            transcendentals=0,
            bytes_accessed=2 * bulk * itemsize + n_partial * 8 * _LANES * 4,
        ),
    )(x2d, t2d)

    # Single cross-lane reduction of a tiny lane-dense partial-sum slab.
    loss = (jnp.sum(partials) + tail_ssd) / jnp.float32(total)

    # Module returns `input` unchanged; loss corresponds to `self.loss`.
    return x, loss


def _ref_loss(x, t):
    d = x.astype(jnp.float32) - t.astype(jnp.float32)
    return jnp.mean(d * d)


if __name__ == "__main__":
    key = jax.random.PRNGKey(0)
    k1, k2 = jax.random.split(key)

    # 1) NCHW, small shape: batch=2, channels=4, spatial=16 (divisible path).
    x = jax.random.normal(k1, (2, 4, 16, 16), dtype=jnp.float32)
    target = jax.random.normal(k2, (2, 4, 16, 16), dtype=jnp.float32)
    out, loss = content_loss_forward(x, target)
    out = jax.block_until_ready(out)
    loss = jax.block_until_ready(loss)
    assert jnp.allclose(loss, _ref_loss(x, target), rtol=1e-5, atol=1e-6)
    assert jnp.array_equal(out, x)

    # 2) Row count not divisible by the sublane tile -> in-kernel mask path.
    x2 = jax.random.normal(k1, (2, 4, 16, 20), dtype=jnp.float32)
    t2 = jax.random.normal(k2, (2, 4, 16, 20), dtype=jnp.float32)
    _, l2 = content_loss_forward(x2, t2)
    assert jnp.allclose(l2, _ref_loss(x2, t2), rtol=1e-5, atol=1e-6)

    # 3) Multi-step grid + two parallel partial sums.
    x3 = jax.random.normal(k1, (1, 32, 32, 64), dtype=jnp.float32)
    t3 = jax.random.normal(k2, (1, 32, 32, 64), dtype=jnp.float32)
    _, l3 = content_loss_forward(x3, t3, row_tile=128, n_partial=2)
    assert jnp.allclose(l3, _ref_loss(x3, t3), rtol=1e-5, atol=1e-6)

    # 4) bf16 inputs (min sublane tile = 16), f32 accumulation.
    x4 = jax.random.normal(k1, (2, 8, 16, 16), dtype=jnp.bfloat16)
    t4 = jax.random.normal(k2, (2, 8, 16, 16), dtype=jnp.bfloat16)
    _, l4 = content_loss_forward(x4, t4)
    assert jnp.allclose(l4, _ref_loss(x4, t4), rtol=1e-4, atol=1e-5)

    # 5) total % 128 != 0 with a Pallas-worthy bulk -> bulk kernel + XLA tail.
    x5 = jax.random.normal(k1, (3, 5, 7, 13), dtype=jnp.float32)
    t5 = jax.random.normal(k2, (3, 5, 7, 13), dtype=jnp.float32)
    _, l5 = content_loss_forward(x5, t5)
    assert jnp.allclose(l5, _ref_loss(x5, t5), rtol=1e-5, atol=1e-6)

    # 6) Tiny tensor -> plain-XLA fallback path.
    x6 = jax.random.normal(k1, (2, 3, 7, 5), dtype=jnp.float32)
    t6 = jax.random.normal(k2, (2, 3, 7, 5), dtype=jnp.float32)
    _, l6 = content_loss_forward(x6, t6)
    assert jnp.allclose(l6, _ref_loss(x6, t6), rtol=1e-5, atol=1e-6)

    jax.block_until_ready((l2, l3, l4, l5, l6))
    print("KERNEL_OK")
</pallas_src>

<mosaic_0001>
module attributes {stable_mosaic.version = 11 : i64} {
  func.func @kernel(%arg0: i32, %arg1: i32, %arg2: memref<16x128xf32, #tpu.memory_space<vmem>>, %arg3: memref<16x128xf32, #tpu.memory_space<vmem>>, %arg4: memref<8x128xf32, #tpu.memory_space<vmem>>) attributes {dimension_semantics = [#tpu.dimension_semantics<parallel>, #tpu.dimension_semantics<arbitrary>], iteration_bounds = array<i64: 1, 1>, scalar_prefetch = 0 : i64, scratch_operands = 0 : i64, tpu.core_type = #tpu.core_type<tc>, window_params = [{transform_indices = @transform_0, window_bounds = array<i64: 16, 128>}, {transform_indices = @transform_1, window_bounds = array<i64: 16, 128>}, {transform_indices = @transform_2, window_bounds = array<i64: 8, 128>}]} {
    %c0_i32 = arith.constant 0 : i32
    %0 = arith.cmpi eq, %arg1, %c0_i32 : i32
    %1 = arith.extui %0 : i1 to i32
    %c0_i32_0 = arith.constant 0 : i32
    %2 = arith.cmpi ne, %1, %c0_i32_0 : i32
    scf.if %2 {
      %cst_8 = arith.constant 0.000000e+00 : f32
      %12 = vector.broadcast %cst_8 : f32 to vector<8x128xf32>
      %c0_9 = arith.constant 0 : index
      %c0_10 = arith.constant 0 : index
      %13 = vector.load %arg4[%c0_9, %c0_10] : memref<8x128xf32, #tpu.memory_space<vmem>>, vector<8x128xf32>
      tpu.vector_store %arg4[%c0_9, %c0_10], %12 {strides = array<i32>} : memref<8x128xf32, #tpu.memory_space<vmem>>, vector<8x128xf32>,
    } else {
    }
    %c0 = arith.constant 0 : index
    %c0_1 = arith.constant 0 : index
    %3 = vector.load %arg2[%c0, %c0_1] : memref<16x128xf32, #tpu.memory_space<vmem>>, vector<16x128xf32>
    %c0_2 = arith.constant 0 : index
    %c0_3 = arith.constant 0 : index
    %4 = vector.load %arg3[%c0_2, %c0_3] : memref<16x128xf32, #tpu.memory_space<vmem>>, vector<16x128xf32>
    %5 = arith.subf %3, %4 : vector<16x128xf32>
    %6 = arith.mulf %5, %5 : vector<16x128xf32>
    %c0_4 = arith.constant 0 : index
    %c0_5 = arith.constant 0 : index
    %7 = vector.load %arg4[%c0_4, %c0_5] : memref<8x128xf32, #tpu.memory_space<vmem>>, vector<8x128xf32>
    %8 = vector.shape_cast %6 : vector<16x128xf32> to vector<2x8x128xf32>
    %cst = arith.constant dense<0.000000e+00> : vector<8x128xf32>
    %9 = vector.multi_reduction <add>, %8, %cst [0] : vector<2x8x128xf32> to vector<8x128xf32>
    %10 = arith.addf %7, %9 : vector<8x128xf32>
    %c0_6 = arith.constant 0 : index
    %c0_7 = arith.constant 0 : index
    %11 = vector.load %arg4[%c0_6, %c0_7] : memref<8x128xf32, #tpu.memory_space<vmem>>, vector<8x128xf32>
    tpu.vector_store %arg4[%c0_6, %c0_7], %10 {strides = array<i32>} : memref<8x128xf32, #tpu.memory_space<vmem>>, vector<8x128xf32>,
    return
  }
  func.func @transform_0(%arg0: i32, %arg1: i32) -> (i32, i32) {
    %c1_i32 = arith.constant 1 : i32
    %0 = arith.muli %arg0, %c1_i32 : i32
    %1 = arith.addi %0, %arg1 : i32
    %c0_i32 = arith.constant 0 : i32
    %c0_i32_0 = arith.constant 0 : i32
    return %1, %c0_i32 : i32, i32
  }
  func.func @transform_1(%arg0: i32, %arg1: i32) -> (i32, i32) {
    %c1_i32 = arith.constant 1 : i32
    %0 = arith.muli %arg0, %c1_i32 : i32
    %1 = arith.addi %0, %arg1 : i32
    %c0_i32 = arith.constant 0 : i32
    %c0_i32_0 = arith.constant 0 : i32
    return %1, %c0_i32 : i32, i32
  }
  func.func @transform_2(%arg0: i32, %arg1: i32) -> (i32, i32) {
    %c0_i32 = arith.constant 0 : i32
    %c0_i32_0 = arith.constant 0 : i32
    return %arg0, %c0_i32 : i32, i32
  }
}

</mosaic_0001>

<bundles_post_ra>
// kernel: tpu_custom_call.1
= control target key start
LH: loop header
LB: loop body
LE: loop exit
PB: predicated region body
PF: predicated region fallthrough
CT: control target
= control target key end

     0   :  { %7 = vsyncpa [#allocation3], 0  ;;  %s204_s0 = inlined_call_operand.hbm [shape: f32[16,128], index: 0, kind: input, shape index: {}]   ;;  %s205_s1 = inlined_call_operand.hbm [shape: f32[16,128], index: 1, kind: input, shape index: {}]   ;;  %s206_s2 = inlined_call_operand.hbm [shape: f32[8,128], index: 2, kind: output, shape index: {}]  }
   0x1   :  { %8 = vsyncpa [#allocation6], 0 }
   0x2   :  { %9 = vsyncpa [#allocation4], 0  ;;  %s18_s11 = sshll.u32 %s204_s0, 4  ;;  %s175_s12 = smov [#allocation2]   ;;  %s19_s11 = int_to_ptr.hbm [resolvable:$true] %s18_s11 }
   0x3   :  { %s20_s13 = sshll.u32 %s175_s12, 4  ;;  %s35_s16 = sshll.u32 %s205_s1, 4  ;;  %s21_s13 = int_to_ptr.vmem [resolvable:$true] %s20_s13  ;;  %s36_s16 = int_to_ptr.hbm [resolvable:$true] %s35_s16 }
   0x4   :  { %s176_s17 = smov 128   ;;  %s177_s18 = smov 8  }
   0x5   :  { %26 = dma.hbm_to_vmem [thread:$0]  %s19_s11, 256, %s21_s13, [#allocation3], %s176_s17, %s176_s17, %s177_s18  }
   0x6   :  { %s178_s19 = smov [#allocation5]  }
   0x7   :  { %s37_s20 = sshll.u32 %s178_s19, 4  ;;  %s38_s20 = int_to_ptr.vmem [resolvable:$true] %s37_s20 }
   0x8   :  { %43 = dma.hbm_to_vmem [thread:$0]  %s36_s16, 256, %s38_s20, [#allocation6], %s176_s17, %s176_s17, %s177_s18  }
   0x9   :  { %169 = dma.done.wait [#allocation3], 256  }
   0xa   :  { %170 = vsyncadd [#allocation3], 4294967040 }
   0xb   :  { %171 = dma.done.wait [#allocation6], 256  }
   0xc   :  { %172 = vsyncadd [#allocation6], 4294967040  ;;  %v61_v0 = vld [vmem:[#allocation2] sm:$0xff]  ;;  %v62_v1 = vld [vmem:[#allocation2 + $0x8] sm:$0xff]  ;;  %s179_s0 = smov [#allocation7]   ;;  %s80_s23 = sshll.u32 %s206_s2, 4  ;;  %s81_s23 = int_to_ptr.hbm [resolvable:$true] %s80_s23 }
   0xd   :  { %v63_v2 = vld [vmem:[#allocation5] sm:$0xff]  ;;  %v64_v3 = vld [vmem:[#allocation5 + $0x8] sm:$0xff]  ;;  %s78_s1 = sshll.u32 %s179_s0, 4  ;;  %s79_s1 = int_to_ptr.vmem [resolvable:$true] %s78_s1 }
   0xe   :  { %v65_v4 = vsub.f32 %v61_v0, %v63_v2  ;;  %v66_v5 = vsub.f32 %v62_v1, %v64_v3 }
  0x10   :  { %v67_v6 = vmul.f32 %v65_v4, %v65_v4  ;;  %v68_v7 = vmul.f32 %v66_v5, %v66_v5 }
  0x12   :  { %v70_v8 = vadd.f32 %v68_v7, %v67_v6 }
  0x14   :  { %72 = vst [vmem:[#allocation7] sm:$0xff] %v70_v8 }
  0x15   :  { %83 = dma.vmem_to_hbm [thread:$0]  %s79_s1, 128, %s81_s23, [#allocation4]  }
  0x16   :  { %173 = dma.done.wait [#allocation4], 128  }
  0x17   :  { %174 = vsyncadd [#allocation4], 4294967168 }
  0x18   :  { %88 = vsyncpa [#allocation3], 1 }
  0x19   :  { %89 = vsyncpa [#allocation6], 1 }
  0x1a   :  { %90 = vsyncpa [#allocation4], 1 }

</bundles_post_ra>
